<compile_context>
chip_gen: v6e
topology: v6e:2x2x1
jax: 0.10.0
libtpu: 0.0.40
codegen_flags: <defaults>
</compile_context>

<pallas_src>
import jax
import jax.numpy as jnp
from jax.experimental import pallas as pl
from jax.experimental.pallas import tpu as pltpu


def _round_up(x: int, m: int) -> int:
    return ((x + m - 1) // m) * m


def _linear_kernel(x_ref, w_ref, b_ref, o_ref):
    # y = x @ W + b : matmul on the MXU (f32 accumulation), bias broadcasts
    # (1, F_out) over the row tile.
    y = jnp.dot(x_ref[...], w_ref[...], preferred_element_type=jnp.float32)
    o_ref[...] = (y + b_ref[...].astype(jnp.float32)).astype(o_ref.dtype)


def aux_head_pallas(x, w, b, *, tile_n: int = 512):
    """out = x @ w + b applied to the last dim of x (like nn.Linear).

    w is [in_features, out_features] (i.e. torch weight.T), b is [out_features].
    Operands are used at whatever dtype they arrive in (cast W/b once at init
    if you want bf16); accumulation is always f32.
    """
    orig_shape = x.shape
    f_in = orig_shape[-1]
    f_out = w.shape[-1]
    x2 = x.reshape(-1, f_in)
    n = x2.shape[0]

    # Row tile: multiple of 8, no larger than the (row-padded) input, and kept
    # small enough that the grid has >=2 steps when possible so v7x's two
    # TensorCores can each take a share of the "parallel" axis.
    tile_n = max(8, min(_round_up(tile_n, 8), _round_up(n, 8)))
    if n > 8:
        tile_n = min(tile_n, _round_up((n + 1) // 2, 8))
    n_p = _round_up(n, tile_n)
    if n_p != n:
        # Row padding only (cheap, and only when N isn't a whole number of tiles).
        x2 = jnp.zeros((n_p, f_in), x2.dtype).at[:n].set(x2)

    b2 = b.reshape(1, f_out)
    grid = (n_p // tile_n,)

    itemsize_x = jnp.dtype(x2.dtype).itemsize
    itemsize_w = jnp.dtype(w.dtype).itemsize
    cost = pl.CostEstimate(
        flops=2 * n_p * f_in * f_out,
        transcendentals=0,
        bytes_accessed=(n_p * f_in * itemsize_x            # x read
                        + f_in * f_out * itemsize_w        # W read
                        + f_out * itemsize_w               # b read
                        + n_p * f_out * itemsize_x),       # out write
    )

    # VMEM: double-buffered x/out tiles + resident W/b (f32-equivalent upper bound).
    vmem_needed = 4 * (2 * tile_n * f_in + f_in * f_out + f_out + 2 * tile_n * f_out)
    vmem_limit = max(32 * 1024 * 1024, min(vmem_needed + (4 << 20), 64 * 1024 * 1024))

    out = pl.pallas_call(
        _linear_kernel,
        out_shape=jax.ShapeDtypeStruct((n_p, f_out), x2.dtype),
        grid_spec=pltpu.PrefetchScalarGridSpec(
            num_scalar_prefetch=0,
            grid=grid,
            in_specs=[
                # x row tile, streamed/pipelined; K dim is the full array dim
                # (bypasses the 128-lane divisibility requirement, no padding).
                pl.BlockSpec((tile_n, f_in), lambda i: (i, 0)),
                # W and b use constant index maps -> VMEM-resident across tiles.
                pl.BlockSpec((f_in, f_out), lambda i: (0, 0)),
                pl.BlockSpec((1, f_out), lambda i: (0, 0)),
            ],
            out_specs=pl.BlockSpec((tile_n, f_out), lambda i: (i, 0)),
        ),
        compiler_params=pltpu.CompilerParams(
            dimension_semantics=("parallel",),   # independent row tiles (2 TCs on v7x)
            vmem_limit_bytes=vmem_limit,
        ),
        cost_estimate=cost,
    )(x2, w, b2)

    if n_p != n:
        out = out[:n]
    return out.reshape(*orig_shape[:-1], f_out)


if __name__ == "__main__":
    # LazyLinear infers in_features from the input's last dim. Use a 3-D input
    # to exercise the leading-dim flattening path; 2*128=256 rows -> grid=(2,).
    B, S, F_IN, F_OUT = 2, 128, 32, 16

    key = jax.random.PRNGKey(0)
    kx, kw, kb = jax.random.split(key, 3)

    x = jax.random.normal(kx, (B, S, F_IN), dtype=jnp.float32)
    # torch.nn.Linear default init U(-1/sqrt(in), 1/sqrt(in)); stored as [in, out] (= weight.T).
    bound = 1.0 / (F_IN ** 0.5)
    w = jax.random.uniform(kw, (F_IN, F_OUT), jnp.float32, -bound, bound)
    b = jax.random.uniform(kb, (F_OUT,), jnp.float32, -bound, bound)

    out = jax.block_until_ready(aux_head_pallas(x, w, b))

    ref = x @ w + b
    assert out.shape == (B, S, F_OUT)
    assert jnp.allclose(out, ref, atol=1e-4, rtol=1e-4), "mismatch vs reference"

    print("KERNEL_OK")
</pallas_src>

<mosaic_0001>
module attributes {stable_mosaic.version = 11 : i64} {
  func.func @_linear_kernel(%arg0: i32, %arg1: memref<128x32xf32, #tpu.memory_space<vmem>>, %arg2: memref<32x16xf32, #tpu.memory_space<vmem>>, %arg3: memref<1x16xf32, #tpu.memory_space<vmem>>, %arg4: memref<128x16xf32, #tpu.memory_space<vmem>>) attributes {dimension_semantics = [#tpu.dimension_semantics<parallel>], iteration_bounds = array<i64: 2>, scalar_prefetch = 0 : i64, scratch_operands = 0 : i64, tpu.core_type = #tpu.core_type<tc>, window_params = [{transform_indices = @transform_0, window_bounds = array<i64: 128, 32>}, {pipeline_mode = #tpu.pipeline_mode<synchronous>, transform_indices = @transform_1, window_bounds = array<i64: 32, 16>}, {pipeline_mode = #tpu.pipeline_mode<synchronous>, transform_indices = @transform_2, window_bounds = array<i64: 1, 16>}, {transform_indices = @transform_3, window_bounds = array<i64: 128, 16>}]} {
    %c0 = arith.constant 0 : index
    %c0_0 = arith.constant 0 : index
    %0 = vector.load %arg1[%c0, %c0_0] : memref<128x32xf32, #tpu.memory_space<vmem>>, vector<128x32xf32>
    %c0_1 = arith.constant 0 : index
    %c0_2 = arith.constant 0 : index
    %1 = vector.load %arg2[%c0_1, %c0_2] : memref<32x16xf32, #tpu.memory_space<vmem>>, vector<32x16xf32>
    %cst = arith.constant dense<0.000000e+00> : vector<128x16xf32>
    %2 = tpu.matmul %0, %1, %cst {dimension_numbers = #tpu.dot_dimension_numbers<[1], [0], [0], [1], [0, 0, 1, 1], [], []>} : vector<128x32xf32>, vector<32x16xf32>, vector<128x16xf32> -> vector<128x16xf32>
    %c0_3 = arith.constant 0 : index
    %c0_4 = arith.constant 0 : index
    %3 = vector.load %arg3[%c0_3, %c0_4] : memref<1x16xf32, #tpu.memory_space<vmem>>, vector<1x16xf32>
    %4 = vector.broadcast %3 : vector<1x16xf32> to vector<128x16xf32>
    %5 = arith.addf %2, %4 : vector<128x16xf32>
    %c0_5 = arith.constant 0 : index
    %c0_6 = arith.constant 0 : index
    %6 = vector.load %arg4[%c0_5, %c0_6] : memref<128x16xf32, #tpu.memory_space<vmem>>, vector<128x16xf32>
    tpu.vector_store %arg4[%c0_5, %c0_6], %5 {strides = array<i32>} : memref<128x16xf32, #tpu.memory_space<vmem>>, vector<128x16xf32>,
    return
  }
  func.func @transform_0(%arg0: i32) -> (i32, i32) {
    %c0_i32 = arith.constant 0 : i32
    %c0_i32_0 = arith.constant 0 : i32
    return %arg0, %c0_i32 : i32, i32
  }
  func.func @transform_1(%arg0: i32) -> (i32, i32) {
    %c0_i32 = arith.constant 0 : i32
    %c0_i32_0 = arith.constant 0 : i32
    %c0_i32_1 = arith.constant 0 : i32
    return %c0_i32, %c0_i32_0 : i32, i32
  }
  func.func @transform_2(%arg0: i32) -> (i32, i32) {
    %c0_i32 = arith.constant 0 : i32
    %c0_i32_0 = arith.constant 0 : i32
    %c0_i32_1 = arith.constant 0 : i32
    return %c0_i32, %c0_i32_0 : i32, i32
  }
  func.func @transform_3(%arg0: i32) -> (i32, i32) {
    %c0_i32 = arith.constant 0 : i32
    %c0_i32_0 = arith.constant 0 : i32
    return %arg0, %c0_i32 : i32, i32
  }
}

</mosaic_0001>

<bundles_post_ra>
// kernel: tpu_custom_call.1
= control target key start
LH: loop header
LB: loop body
LE: loop exit
PB: predicated region body
PF: predicated region fallthrough
CT: control target
= control target key end

     0   :  { %s592_s12 = smov 0   ;;  %s699_s0 = inlined_call_operand.vmem [shape: f32[256,32], index: 0, kind: input, shape index: {}]   ;;  %s700_s1 = inlined_call_operand.vmem [shape: f32[32,16], index: 1, kind: input, shape index: {}]   ;;  %s701_s2 = inlined_call_operand.vmem [shape: f32[1,16], index: 2, kind: input, shape index: {}]   ;;  %s702_s3 = inlined_call_operand.vmem [shape: f32[256,16], index: 3, kind: output, shape index: {}]  }
   0x1 LB: > { %s468_s13 = sadd.s32 4294967295, %s570_s12   ;;  %p472_p0 = scmp.ge.s32.totalorder %s570_s12, 1  ;;  %s570_s12 = sphi %s592_s12, %s13_s12  }
   0x2   : > { %p138_p1 = scmp.lt.s32.totalorder %s570_s12, 3 }
   0x4   : > { %p139_p2 = pnand %p472_p0, %p138_p1 }
   0x5   : > { %s473_s18 = sshll.u32 (!%p139_p2), %s468_s13, 4 }
   0x6   : > { %142 = sbr.rel (%p139_p2) target bundleno = 231 (0xe7), region = 32  ;;  %p163_p3 = scmp.lt.s32.totalorder (!%p139_p2), %s473_s18, 31 }
   0xb   : > { %v193_v0 = vld [vmem:[%s700_s1 + $0x18] sm:$0xff]  ;;  %v192_v1 = vld [vmem:[%s700_s1 + $0x10] sm:$0xff]  ;;  %v191_v2 = vld [vmem:[%s700_s1 + $0x8] sm:$0xff]  ;;  %s704_s18 = smov (!%p163_p3, %s473_s18), 31  ;;  %vm201_vm0 = vcmask 261120   ;;  %vm395_vm1 = vcmask 130048  }
   0xc   : > { %516 = vmatprep.subr.mxu0 %v193_v0  ;;  %548 = vmatprep.subr.mxu1 %v193_v0  ;;  %v190_v3 = vld [vmem:[%s700_s1] sm:$0xff]  ;;  %s474_s23 = sshll.u32 %s704_s18, 3 }
   0xd   : > { %517 = vmatpush3.msra.mxu0 %v193_v0  ;;  %552 = vmatpush3.msra.mxu1 %v193_v0  ;;  %s620_s26 = scalar_lea.vmem %s699_s0, %s474_s23  ;;  %v477_v20 = vld [vmem:[%s701_s2] ss:$0 sm:$0xff]  ;;  %s662_s4 = scalar_lea.vmem %s702_s3, %s474_s23 }
   0xe   : > { %518 = vmatprep.subr.mxu0 %v192_v1  ;;  %549 = vmatprep.subr.mxu1 %v192_v1  ;;  %v174_v4 = vld [vmem:[%s620_s26] sm:$0xff]  ;;  %v175_v6 = vld [vmem:[%s620_s26 + $0x8] sm:$0xff]  ;;  %v176_v8 = vld [vmem:[%s620_s26 + $0x10] sm:$0xff] }
   0xf   : > { %519 = vmatpush3.msra.mxu0 %v192_v1  ;;  %553 = vmatpush3.msra.mxu1 %v192_v1  ;;  %v182_v5 = vld [vmem:[%s620_s26 + $0x40] sm:$0xff]  ;;  %v183_v7 = vld [vmem:[%s620_s26 + $0x48] sm:$0xff]  ;;  %v184_v9 = vld [vmem:[%s620_s26 + $0x50] sm:$0xff] }
  0x10   : > { %520 = vmatprep.subr.mxu0 %v191_v2  ;;  %550 = vmatprep.subr.mxu1 %v191_v2  ;;  %v177_v10 = vld [vmem:[%s620_s26 + $0x18] sm:$0xff]  ;;  %v178_v12 = vld [vmem:[%s620_s26 + $0x20] sm:$0xff]  ;;  %v179_v14 = vld [vmem:[%s620_s26 + $0x28] sm:$0xff] }
  0x11   : > { %521 = vmatpush3.msra.mxu0 %v191_v2  ;;  %554 = vmatpush3.msra.mxu1 %v191_v2  ;;  %v185_v11 = vld [vmem:[%s620_s26 + $0x58] sm:$0xff]  ;;  %v186_v13 = vld [vmem:[%s620_s26 + $0x60] sm:$0xff]  ;;  %v187_v15 = vld [vmem:[%s620_s26 + $0x68] sm:$0xff] }
  0x12   : > { %522 = vmatprep.subr.mxu0 %v190_v3  ;;  %551 = vmatprep.subr.mxu1 %v190_v3  ;;  %v180_v16 = vld [vmem:[%s620_s26 + $0x30] sm:$0xff]  ;;  %v181_v18 = vld [vmem:[%s620_s26 + $0x38] sm:$0xff] }
  0x13   : > { %523 = vmatpush3.msra.mxu0 %v190_v3  ;;  %555 = vmatpush3.msra.mxu1 %v190_v3  ;;  %v188_v17 = vld [vmem:[%s620_s26 + $0x70] sm:$0xff]  ;;  %v189_v19 = vld [vmem:[%s620_s26 + $0x78] sm:$0xff] }
  0x14   : > { %524 = vmatprep.mubr.msk.f32.mxu0 %vm201_vm0, %v174_v4  ;;  %536 = vmatprep.mubr.msk.f32.mxu1 %vm201_vm0, %v182_v5 }
  0x15   : > { %525 = vmatmul.mubr.msk.f32.vlgmr.msra.gmra.mxu0 %vm201_vm0, %v175_v6  ;;  %537 = vmatmul.mubr.msk.f32.vlgmr.msra.gmra.mxu1 %vm201_vm0, %v183_v7 }
  0x16   : > { %527 = vmatprep.mubr.msk.f32.mxu0 %vm201_vm0, %v176_v8  ;;  %539 = vmatprep.mubr.msk.f32.mxu1 %vm201_vm0, %v184_v9 }
  0x19   : > { %528 = vmatmul.mubr.msk.f32.gmra.mxu0 %vm201_vm0, %v177_v10  ;;  %540 = vmatmul.mubr.msk.f32.gmra.mxu1 %vm201_vm0, %v185_v11 }
  0x1a   : > { %530 = vmatprep.mubr.msk.f32.mxu0 %vm201_vm0, %v178_v12  ;;  %542 = vmatprep.mubr.msk.f32.mxu1 %vm201_vm0, %v186_v13 }
  0x1d   : > { %531 = vmatmul.mubr.msk.f32.gmra.mxu0 %vm201_vm0, %v179_v14  ;;  %543 = vmatmul.mubr.msk.f32.gmra.mxu1 %vm201_vm0, %v187_v15 }
  0x1e   : > { %533 = vmatprep.mubr.msk.f32.mxu0 %vm201_vm0, %v180_v16  ;;  %545 = vmatprep.mubr.msk.f32.mxu1 %vm201_vm0, %v188_v17 }
  0x21   : > { %534 = vmatmul.mubr.msk.f32.gmra.mxu0 %vm201_vm0, %v181_v18  ;;  %546 = vmatmul.mubr.msk.f32.gmra.mxu1 %vm201_vm0, %v189_v19 }
  0xd5   : > { %v526_v21 = vpop.f32.mrf.mxu0  ;;  %v538_v22 = vpop.f32.mrf.mxu1 }
  0xd6   : > { %v322_v23 = vadd.f32 %v526_v21, %v477_v20  ;;  %v362_v24 = vadd.f32 %v538_v22, %v477_v20 }
  0xd7   : > { %v316_v25 = vpop.f32.mrf.mxu0  ;;  %v356_v26 = vpop.f32.mrf.mxu1 }
  0xd8   : > { %397 = vst.msk [vmem:[%s662_s4 + $0x8] sm:$0xff] %vm395_vm1, %v322_v23  ;;  %405 = vst.msk [vmem:[%s662_s4 + $0x48] sm:$0xff] %vm395_vm1, %v362_v24  ;;  %v317_v27 = vadd.f32 %v477_v20, %v316_v25  ;;  %v357_v28 = vadd.f32 %v477_v20, %v356_v26 }
  0xd9   : > { %v529_v29 = vpop.f32.mrf.mxu0  ;;  %v541_v30 = vpop.f32.mrf.mxu1 }
  0xda   : > { %396 = vst.msk [vmem:[%s662_s4] sm:$0xff] %vm395_vm1, %v317_v27  ;;  %404 = vst.msk [vmem:[%s662_s4 + $0x40] sm:$0xff] %vm395_vm1, %v357_v28  ;;  %v332_v31 = vadd.f32 %v529_v29, %v477_v20  ;;  %v372_v32 = vadd.f32 %v541_v30, %v477_v20 }
  0xdb   : > { %v326_v33 = vpop.f32.mrf.mxu0  ;;  %v366_v34 = vpop.f32.mrf.mxu1 }
  0xdc   : > { %399 = vst.msk [vmem:[%s662_s4 + $0x18] sm:$0xff] %vm395_vm1, %v332_v31  ;;  %407 = vst.msk [vmem:[%s662_s4 + $0x58] sm:$0xff] %vm395_vm1, %v372_v32  ;;  %v327_v35 = vadd.f32 %v477_v20, %v326_v33  ;;  %v367_v36 = vadd.f32 %v477_v20, %v366_v34 }
  0xdd   : > { %v532_v37 = vpop.f32.mrf.mxu0  ;;  %v544_v38 = vpop.f32.mrf.mxu1 }
  0xde   : > { %398 = vst.msk [vmem:[%s662_s4 + $0x10] sm:$0xff] %vm395_vm1, %v327_v35  ;;  %406 = vst.msk [vmem:[%s662_s4 + $0x50] sm:$0xff] %vm395_vm1, %v367_v36  ;;  %v342_v39 = vadd.f32 %v532_v37, %v477_v20  ;;  %v382_v40 = vadd.f32 %v544_v38, %v477_v20 }
  0xdf   : > { %v336_v41 = vpop.f32.mrf.mxu0  ;;  %v376_v42 = vpop.f32.mrf.mxu1 }
  0xe0   : > { %401 = vst.msk [vmem:[%s662_s4 + $0x28] sm:$0xff] %vm395_vm1, %v342_v39  ;;  %409 = vst.msk [vmem:[%s662_s4 + $0x68] sm:$0xff] %vm395_vm1, %v382_v40  ;;  %v337_v43 = vadd.f32 %v477_v20, %v336_v41  ;;  %v377_v44 = vadd.f32 %v477_v20, %v376_v42 }
  0xe1   : > { %v535_v45 = vpop.f32.mrf.mxu0  ;;  %v547_v46 = vpop.f32.mrf.mxu1 }
  0xe2   : > { %400 = vst.msk [vmem:[%s662_s4 + $0x20] sm:$0xff] %vm395_vm1, %v337_v43  ;;  %408 = vst.msk [vmem:[%s662_s4 + $0x60] sm:$0xff] %vm395_vm1, %v377_v44  ;;  %v352_v47 = vadd.f32 %v535_v45, %v477_v20  ;;  %v392_v48 = vadd.f32 %v547_v46, %v477_v20 }
  0xe3   : > { %v346_v49 = vpop.f32.mrf.mxu0  ;;  %v386_v50 = vpop.f32.mrf.mxu1 }
  0xe4   : > { %403 = vst.msk [vmem:[%s662_s4 + $0x38] sm:$0xff] %vm395_vm1, %v352_v47  ;;  %411 = vst.msk [vmem:[%s662_s4 + $0x78] sm:$0xff] %vm395_vm1, %v392_v48  ;;  %v347_v51 = vadd.f32 %v477_v20, %v346_v49  ;;  %v387_v52 = vadd.f32 %v477_v20, %v386_v50 }
  0xe6   : > { %402 = vst.msk [vmem:[%s662_s4 + $0x30] sm:$0xff] %vm395_vm1, %v347_v51  ;;  %410 = vst.msk [vmem:[%s662_s4 + $0x70] sm:$0xff] %vm395_vm1, %v387_v52 }
  0xe7 PF: > { %s13_s12 = sadd.s32 1, %s570_s12  }
  0xe8   : > { %p10_p4 = scmp.ge.s32.totalorder %s13_s12, 4  }
  0xea   :  { %12 = sbr.rel (!%p10_p4) target bundleno = 1 (0x1), region = 62 }

</bundles_post_ra>
